<compile_context>
chip_gen: v7x
topology: tpu7x:2x2x1
jax: 0.10.0
libtpu: 0.0.40
codegen_flags: <defaults>
</compile_context>

<pallas_src>
import jax
import jax.numpy as jnp
from jax.experimental import pallas as pl
from jax.experimental.pallas import tpu as pltpu


def _lora_kernel(scale_ref, w_ref, b_ref, a_ref, o_ref):
    # Low-rank delta on the MXU (f32 accumulate), scaled add on the VPU.
    scale = scale_ref[0, 0]
    delta = jnp.dot(b_ref[...], a_ref[...], preferred_element_type=jnp.float32)
    o_ref[...] = (w_ref[...].astype(jnp.float32) + delta * scale).astype(o_ref.dtype)


def lora_forward(original_weights, lora_B, lora_A, scale, enabled=True,
                 *, tile_m=256, tile_n=1024):
    """out = original_weights + (lora_B @ lora_A) * scale  (Pallas kernel)."""
    if not enabled:
        return original_weights

    M, N = original_weights.shape
    r = lora_B.shape[1]
    assert lora_B.shape == (M, r) and lora_A.shape == (r, N)

    # Adaptive tiles: full dim if small, otherwise the (8,128)-aligned default.
    tm = M if M <= tile_m else tile_m          # tile_m is a multiple of 8
    tn = N if N <= tile_n else tile_n          # tile_n is a multiple of 128
    grid_m = pl.cdiv(M, tm)
    grid_n = pl.cdiv(N, tn)

    w_isize = jnp.dtype(original_weights.dtype).itemsize
    b_isize = jnp.dtype(lora_B.dtype).itemsize
    a_isize = jnp.dtype(lora_A.dtype).itemsize

    # Double-buffered W + out tiles dominate; B/A slabs are r-sized (KiB).
    needed = (2 * 2 * tm * tn * w_isize      # W in + out, double-buffered
              + 2 * tm * r * b_isize         # lora_B tile
              + 2 * r * tn * a_isize)        # lora_A slab
    vmem_limit = int(min(max(2 * needed, 32 * 1024 * 1024), 48 * 1024 * 1024))

    cost = pl.CostEstimate(
        flops=2 * M * N * r,
        transcendentals=0,
        bytes_accessed=2 * M * N * w_isize + M * r * b_isize + r * N * a_isize,
    )

    scale_arr = jnp.full((1, 1), scale, dtype=jnp.float32)

    return pl.pallas_call(
        _lora_kernel,
        out_shape=jax.ShapeDtypeStruct((M, N), original_weights.dtype),
        grid_spec=pltpu.PrefetchScalarGridSpec(
            num_scalar_prefetch=0,
            grid=(grid_m, grid_n),                               # j innermost
            in_specs=[
                pl.BlockSpec(memory_space=pltpu.MemorySpace.SMEM),  # scale (1,1)
                pl.BlockSpec((tm, tn), lambda i, j: (i, j)),        # W tile
                pl.BlockSpec((tm, r), lambda i, j: (i, 0)),         # lora_B (resident over j)
                pl.BlockSpec((r, tn), lambda i, j: (0, j)),         # lora_A slab
            ],
            out_specs=pl.BlockSpec((tm, tn), lambda i, j: (i, j)),
        ),
        compiler_params=pltpu.CompilerParams(
            dimension_semantics=("parallel", "parallel"),
            vmem_limit_bytes=vmem_limit,
        ),
        cost_estimate=cost,
        # TODO(synk): optionally alias original_weights -> output
        # (input_output_aliases={1: 0}) when the caller donates the weight
        # buffer for an in-place merge.
    )(scale_arr, original_weights, lora_B, lora_A)


if __name__ == "__main__":
    # Module __init__ shapes: lora_B zeros(features_in, rank),
    #                         lora_A ~ N(0, 1) of (rank, features_out)
    features_in, features_out, rank, alpha = 256, 384, 8, 16
    scale = alpha / rank

    key = jax.random.PRNGKey(0)
    k_w, k_a, k_b = jax.random.split(key, 3)

    original_weights = jax.random.normal(k_w, (features_in, features_out), jnp.float32)
    lora_A = jax.random.normal(k_a, (rank, features_out), jnp.float32)  # nn.init.normal_
    # The module initializes lora_B to zeros; use small random values here so
    # the kernel's matmul path is actually exercised numerically.
    lora_B = 0.01 * jax.random.normal(k_b, (features_in, rank), jnp.float32)

    out = jax.block_until_ready(lora_forward(original_weights, lora_B, lora_A, scale))
    ref = original_weights + (lora_B @ lora_A) * scale
    assert jnp.allclose(out, ref, atol=1e-5, rtol=1e-5), "mismatch vs reference"

    # enabled=False path returns weights unchanged.
    out_disabled = jax.block_until_ready(
        lora_forward(original_weights, lora_B, lora_A, scale, enabled=False)
    )
    assert jnp.array_equal(out_disabled, original_weights)

    # Ragged-shape path (M not divisible by tile_m), handled by pl.cdiv grids.
    M2, N2 = 264, 200
    w2 = jax.random.normal(k_w, (M2, N2), jnp.float32)
    a2 = jax.random.normal(k_a, (rank, N2), jnp.float32)
    b2 = 0.01 * jax.random.normal(k_b, (M2, rank), jnp.float32)
    out2 = jax.block_until_ready(lora_forward(w2, b2, a2, scale, tile_m=128))
    ref2 = w2 + (b2 @ a2) * scale
    assert jnp.allclose(out2, ref2, atol=1e-5, rtol=1e-5), "ragged mismatch"

    print("KERNEL_OK")
</pallas_src>

<mosaic_0001>
module attributes {stable_mosaic.version = 11 : i64} {
  func.func @_lora_kernel(%arg0: i32, %arg1: i32, %arg2: memref<1x1xf32, #tpu.memory_space<smem>>, %arg3: memref<256x384xf32, #tpu.memory_space<vmem>>, %arg4: memref<256x8xf32, #tpu.memory_space<vmem>>, %arg5: memref<8x384xf32, #tpu.memory_space<vmem>>, %arg6: memref<256x384xf32, #tpu.memory_space<vmem>>) attributes {dimension_semantics = [#tpu.dimension_semantics<parallel>, #tpu.dimension_semantics<parallel>], iteration_bounds = array<i64: 1, 1>, scalar_prefetch = 0 : i64, scratch_operands = 0 : i64, tpu.core_type = #tpu.core_type<tc>, window_params = [{transform_indices = @transform_0, window_bounds = array<i64: 1, 1>}, {transform_indices = @transform_1, window_bounds = array<i64: 256, 384>}, {transform_indices = @transform_2, window_bounds = array<i64: 256, 8>}, {transform_indices = @transform_3, window_bounds = array<i64: 8, 384>}, {transform_indices = @transform_4, window_bounds = array<i64: 256, 384>}]} {
    %c0 = arith.constant 0 : index
    %c0_0 = arith.constant 0 : index
    %0 = memref.load %arg2[%c0, %c0_0] : memref<1x1xf32, #tpu.memory_space<smem>>
    %c0_1 = arith.constant 0 : index
    %c0_2 = arith.constant 0 : index
    %1 = vector.load %arg4[%c0_1, %c0_2] : memref<256x8xf32, #tpu.memory_space<vmem>>, vector<256x8xf32>
    %c0_3 = arith.constant 0 : index
    %c0_4 = arith.constant 0 : index
    %2 = vector.load %arg5[%c0_3, %c0_4] : memref<8x384xf32, #tpu.memory_space<vmem>>, vector<8x384xf32>
    %cst = arith.constant dense<0.000000e+00> : vector<256x384xf32>
    %3 = tpu.matmul %1, %2, %cst {dimension_numbers = #tpu.dot_dimension_numbers<[1], [0], [0], [1], [0, 0, 1, 1], [], []>} : vector<256x8xf32>, vector<8x384xf32>, vector<256x384xf32> -> vector<256x384xf32>
    %c0_5 = arith.constant 0 : index
    %c0_6 = arith.constant 0 : index
    %4 = vector.load %arg3[%c0_5, %c0_6] : memref<256x384xf32, #tpu.memory_space<vmem>>, vector<256x384xf32>
    %5 = vector.broadcast %0 : f32 to vector<256x384xf32>
    %6 = arith.mulf %3, %5 : vector<256x384xf32>
    %7 = arith.addf %4, %6 : vector<256x384xf32>
    %c0_7 = arith.constant 0 : index
    %c0_8 = arith.constant 0 : index
    %8 = vector.load %arg6[%c0_7, %c0_8] : memref<256x384xf32, #tpu.memory_space<vmem>>, vector<256x384xf32>
    tpu.vector_store %arg6[%c0_7, %c0_8], %7 {strides = array<i32>} : memref<256x384xf32, #tpu.memory_space<vmem>>, vector<256x384xf32>,
    return
  }
  func.func @transform_0(%arg0: i32, %arg1: i32) -> (i32, i32) {
    %c0_i32 = arith.constant 0 : i32
    %c0_i32_0 = arith.constant 0 : i32
    %c0_i32_1 = arith.constant 0 : i32
    return %c0_i32, %c0_i32_0 : i32, i32
  }
  func.func @transform_1(%arg0: i32, %arg1: i32) -> (i32, i32) {
    %c0_i32 = arith.constant 0 : i32
    return %arg0, %arg1 : i32, i32
  }
  func.func @transform_2(%arg0: i32, %arg1: i32) -> (i32, i32) {
    %c0_i32 = arith.constant 0 : i32
    %c0_i32_0 = arith.constant 0 : i32
    return %arg0, %c0_i32 : i32, i32
  }
  func.func @transform_3(%arg0: i32, %arg1: i32) -> (i32, i32) {
    %c0_i32 = arith.constant 0 : i32
    %c0_i32_0 = arith.constant 0 : i32
    return %c0_i32, %arg1 : i32, i32
  }
  func.func @transform_4(%arg0: i32, %arg1: i32) -> (i32, i32) {
    %c0_i32 = arith.constant 0 : i32
    return %arg0, %arg1 : i32, i32
  }
}

</mosaic_0001>

<bundles_post_ra>
// kernel: tpu_custom_call.1
= control target key start
LH: loop header
LB: loop body
LE: loop exit
PB: predicated region body
PF: predicated region fallthrough
CT: control target
= control target key end

     0   :  { %10 = vsyncpa [#allocation4], 0  ;;  %s1646_s0 = inlined_call_operand.<no memory space> [shape: f32[1,1], index: 0, kind: input, shape index: {}]   ;;  %s1647_s1 = inlined_call_operand.hbm [shape: f32[256,384], index: 1, kind: input, shape index: {}]   ;;  %s1648_s2 = inlined_call_operand.vmem [shape: f32[256,8], index: 2, kind: input, shape index: {}]   ;;  %s1649_s3 = inlined_call_operand.vmem [shape: f32[8,384], index: 3, kind: input, shape index: {}]   ;;  %s1650_s4 = inlined_call_operand.hbm [shape: f32[256,384], index: 4, kind: output, shape index: {}]  }
   0x1   :  { %11 = vsyncpa [#allocation5], 0  ;;  %s1252_s15 = smov [#allocation3]   ;;  %s1204_s19 = scalar_lea.hbm %s1647_s1, 12288 }
   0x2   :  { %s19_s16 = sshll.u32 %s1252_s15, 4  ;;  %p1205_p0 = scmp.ne.s32.totalorder %s1647_s1, %s1204_s19  ;;  %s20_s16 = int_to_ptr.vmem [resolvable:$true] %s19_s16 }
   0x3   :  { %p1208_p1 = scmp.lt.u32.totalorder %s1204_s19, %s1647_s1 }
   0x5   :  { %p1210_p2 = pnand %p1208_p1, %p1205_p0 }
   0x7   :  { %1213 = shalt.err (!%p1210_p2)
}
   0x8   :  { %s1214_s24 = scalar_lea.vmem %s20_s16, 12288  ;;  %p1219_p4 = scmp.lt.s32.totalorder %s20_s16, %s20_s16 }
   0x9   :  { %p1215_p3 = scmp.ne.s32.totalorder %s20_s16, %s1214_s24  ;;  %p1220_p5 = scmp.lt.s32.totalorder %s1214_s24, %s1214_s24 }
   0xb   :  { %p1221_p6 = por %p1220_p5, %p1219_p4 }
   0xd   :  { %p1222_p7 = pnand %p1221_p6, %p1215_p3 }
   0xf   :  { %1225 = shalt.err (!%p1222_p7)
}
  0x10   :  { %s1253_s25 = smov 384   ;;  %s1254_s26 = smov 24  }
  0x11   :  { %25 = dma.hbm_to_vmem [thread:$0]  %s1647_s1, 12288, %s20_s16, [#allocation4], %s1253_s25, %s1253_s25, %s1254_s26  }
  0x12   :  { %1248 = dma.done.wait [#allocation4], 12288  }
  0x13   :  { %1249 = vsyncadd [#allocation4], 4294955008  ;;  %v1255_v0 = vmov 0.0   ;;  %v67_v1 = vld [vmem:[%s1649_s3 + $0x8] sm:$0xff]  ;;  %v66_v2 = vld [vmem:[%s1649_s3] sm:$0xff]  ;;  %vm69_vm0 = vcmask 64512   ;;  %v1533_v36 = vstv %s1646_s0 }
  0x14   :  { %230 = vmatprep.mubr.f32.mxu0 %v1255_v0  ;;  %374 = vmatprep.mubr.f32.mxu1 %v1255_v0  ;;  %v34_v3 = vld [vmem:[%s1648_s2] sm:$0xff]  ;;  %v68_v5 = vld [vmem:[%s1649_s3 + $0x10] sm:$0xff]  ;;  %v35_v6 = vld [vmem:[%s1648_s2 + $0x8] sm:$0xff]  ;;  %s1256_s0 = smov [#allocation6]  }
  0x15   :  { %166 = vmatprep.subr.mxu0 %v67_v1  ;;  %1197 = vmatprep.subr.mxu1 %v67_v1  ;;  %v1311_v4 = vld [vmem:[%s1648_s2 + $0xc0] sm:$0xff]  ;;  %v1326_v7 = vld [vmem:[%s1648_s2 + $0xc8] sm:$0xff]  ;;  %v36_v8 = vld [vmem:[%s1648_s2 + $0x10] sm:$0xff]  ;;  %s1038_s20 = sshll.u32 %s1256_s0, 4  ;;  %s1039_s20 = int_to_ptr.vmem [resolvable:$true] %s1038_s20 }
  0x16   :  { %167 = vmatpush1.msra.mxu0 %v66_v2  ;;  %1198 = vmatpush1.msra.mxu1 %v66_v2  ;;  %v1340_v9 = vld [vmem:[%s1648_s2 + $0xd0] sm:$0xff]  ;;  %v37_v10 = vld [vmem:[%s1648_s2 + $0x18] sm:$0xff]  ;;  %v38_v12 = vld [vmem:[%s1648_s2 + $0x20] sm:$0xff]  ;;  %s1226_s21 = scalar_lea.vmem %s1039_s20, 12288  ;;  %p1231_p9 = scmp.lt.s32.totalorder %s1039_s20, %s1039_s20 }
  0x17   :  { %1050 = vmatmul.mubr.msk.f32.vlgmr.msra.gmra.mrb[0].mxu0 %vm69_vm0, %v34_v3  ;;  %1074 = vmatmul.mubr.msk.f32.vlgmr.msra.gmra.mrb[0].mxu1 %vm69_vm0, %v1311_v4  ;;  %v1353_v11 = vld [vmem:[%s1648_s2 + $0xd8] sm:$0xff]  ;;  %v1366_v13 = vld [vmem:[%s1648_s2 + $0xe0] sm:$0xff]  ;;  %v39_v14 = vld [vmem:[%s1648_s2 + $0x28] sm:$0xff]  ;;  %p1227_p8 = scmp.ne.s32.totalorder %s1039_s20, %s1226_s21  ;;  %p1232_p10 = scmp.lt.s32.totalorder %s1226_s21, %s1226_s21 }
  0x18   :  { %1147 = vmatprep.subr.mxu1 %v68_v5  ;;  %236 = vmatprep.mubr.f32.mxu0 %v1255_v0  ;;  %v1379_v15 = vld [vmem:[%s1648_s2 + $0xe8] sm:$0xff]  ;;  %v40_v16 = vld [vmem:[%s1648_s2 + $0x30] sm:$0xff]  ;;  %v41_v18 = vld [vmem:[%s1648_s2 + $0x38] sm:$0xff] }
  0x19   :  { %1148 = vmatpush3.msra.mxu1 %v68_v5  ;;  %380 = vmatprep.mubr.f32.mxu1 %v1255_v0  ;;  %v1392_v17 = vld [vmem:[%s1648_s2 + $0xf0] sm:$0xff]  ;;  %v1405_v19 = vld [vmem:[%s1648_s2 + $0xf8] sm:$0xff]  ;;  %v42_v20 = vld [vmem:[%s1648_s2 + $0x40] sm:$0xff]  ;;  %p1233_p11 = por %p1232_p10, %p1231_p9 }
  0x1a   :  { %v43_v21 = vld [vmem:[%s1648_s2 + $0x48] sm:$0xff]  ;;  %v44_v22 = vld [vmem:[%s1648_s2 + $0x50] sm:$0xff]  ;;  %v45_v23 = vld [vmem:[%s1648_s2 + $0x58] sm:$0xff] }
  0x1b   :  { %1051 = vmatmul.mubr.msk.f32.gmra.mrb[2].mxu0 %vm69_vm0, %v35_v6  ;;  %1075 = vmatmul.mubr.msk.f32.gmra.mrb[2].mxu1 %vm69_vm0, %v1326_v7  ;;  %v46_v24 = vld [vmem:[%s1648_s2 + $0x60] sm:$0xff]  ;;  %v47_v25 = vld [vmem:[%s1648_s2 + $0x68] sm:$0xff]  ;;  %v48_v26 = vld [vmem:[%s1648_s2 + $0x70] sm:$0xff]  ;;  %p1234_p12 = pnand %p1233_p11, %p1227_p8 }
  0x1c   :  { %242 = vmatprep.mubr.f32.mxu0 %v1255_v0  ;;  %386 = vmatprep.mubr.f32.mxu1 %v1255_v0  ;;  %v49_v27 = vld [vmem:[%s1648_s2 + $0x78] sm:$0xff]  ;;  %v50_v28 = vld [vmem:[%s1648_s2 + $0x80] sm:$0xff]  ;;  %v51_v29 = vld [vmem:[%s1648_s2 + $0x88] sm:$0xff] }
  0x1d   :  { %v52_v30 = vld [vmem:[%s1648_s2 + $0x90] sm:$0xff]  ;;  %v53_v31 = vld [vmem:[%s1648_s2 + $0x98] sm:$0xff]  ;;  %v54_v32 = vld [vmem:[%s1648_s2 + $0xa0] sm:$0xff] }
  0x1e   :  { %v55_v33 = vld [vmem:[%s1648_s2 + $0xa8] sm:$0xff]  ;;  %v56_v34 = vld [vmem:[%s1648_s2 + $0xb0] sm:$0xff]  ;;  %v57_v35 = vld [vmem:[%s1648_s2 + $0xb8] sm:$0xff] }
  0x1f   :  { %1052 = vmatmul.mubr.msk.f32.gmra.mrb[4].mxu0 %vm69_vm0, %v36_v8  ;;  %1076 = vmatmul.mubr.msk.f32.gmra.mrb[4].mxu1 %vm69_vm0, %v1340_v9  ;;  %v648_v38 = vld [vmem:[#allocation3] sm:$0xff]  ;;  %v649_v44 = vld [vmem:[#allocation3 + $0x8] sm:$0xff]  ;;  %v651_v54 = vld [vmem:[#allocation3 + $0x18] sm:$0xff] }
  0x20   :  { %248 = vmatprep.mubr.f32.mxu0 %v1255_v0  ;;  %392 = vmatprep.mubr.f32.mxu1 %v1255_v0  ;;  %v720_v40 = vld [vmem:[#allocation3 + $0x240] sm:$0xff]  ;;  %v721_v46 = vld [vmem:[#allocation3 + $0x248] sm:$0xff]  ;;  %v723_v56 = vld [vmem:[#allocation3 + $0x258] sm:$0xff] }
  0x21   :  { %v652_v60 = vld [vmem:[#allocation3 + $0x20] sm:$0xff] }
  0x22   :  { %v724_v62 = vld [vmem:[#allocation3 + $0x260] sm:$0xff] }
  0x23   :  { %1053 = vmatmul.mubr.msk.f32.gmra.mrb[6].mxu0 %vm69_vm0, %v37_v10  ;;  %1077 = vmatmul.mubr.msk.f32.gmra.mrb[6].mxu1 %vm69_vm0, %v1353_v11 }
  0x24   :  { %254 = vmatprep.mubr.f32.mxu0 %v1255_v0  ;;  %398 = vmatprep.mubr.f32.mxu1 %v1255_v0 }
  0x27   :  { %1054 = vmatmul.mubr.msk.f32.gmra.mrb[8].mxu0 %vm69_vm0, %v38_v12  ;;  %1078 = vmatmul.mubr.msk.f32.gmra.mrb[8].mxu1 %vm69_vm0, %v1366_v13 }
  0x28   :  { %260 = vmatprep.mubr.f32.mxu0 %v1255_v0  ;;  %404 = vmatprep.mubr.f32.mxu1 %v1255_v0 }
  0x2b   :  { %1055 = vmatmul.mubr.msk.f32.gmra.mrb[10].mxu0 %vm69_vm0, %v39_v14  ;;  %1079 = vmatmul.mubr.msk.f32.gmra.mrb[10].mxu1 %vm69_vm0, %v1379_v15 }
  0x2c   :  { %266 = vmatprep.mubr.f32.mxu0 %v1255_v0  ;;  %410 = vmatprep.mubr.f32.mxu1 %v1255_v0 }
  0x2f   :  { %1056 = vmatmul.mubr.msk.f32.gmra.mrb[12].mxu0 %vm69_vm0, %v40_v16  ;;  %1080 = vmatmul.mubr.msk.f32.gmra.mrb[12].mxu1 %vm69_vm0, %v1392_v17 }
  0x30   :  { %272 = vmatprep.mubr.f32.mxu0 %v1255_v0  ;;  %416 = vmatprep.mubr.f32.mxu1 %v1255_v0 }
  0x33   :  { %1057 = vmatmul.mubr.msk.f32.gmra.mrb[14].mxu0 %vm69_vm0, %v41_v18  ;;  %1081 = vmatmul.mubr.msk.f32.gmra.mrb[14].mxu1 %vm69_vm0, %v1405_v19 }
  0x34   :  { %278 = vmatprep.mubr.f32.mxu0 %v1255_v0  ;;  %1149 = vmatprep.mubr.msk.f32.mxu1 %vm69_vm0, %v34_v3 }
  0x37   :  { %1058 = vmatmul.mubr.msk.f32.gmra.mrb[16].mxu0 %vm69_vm0, %v42_v20  ;;  %1150 = vmatmul.mubr.msk.f32.vlgmr.msra.gmra.mrb[16].mxu1 %vm69_vm0, %v35_v6  ;;  %v654_v6 = vld [vmem:[#allocation3 + $0x30] sm:$0xff] }
  0x38   :  { %284 = vmatprep.mubr.f32.mxu0 %v1255_v0  ;;  %1152 = vmatprep.mubr.msk.f32.mxu1 %vm69_vm0, %v36_v8  ;;  %v726_v8 = vld [vmem:[#allocation3 + $0x270] sm:$0xff] }
  0x3b   :  { %1059 = vmatmul.mubr.msk.f32.gmra.mrb[18].mxu0 %vm69_vm0, %v43_v21  ;;  %1153 = vmatmul.mubr.msk.f32.gmra.mrb[18].mxu1 %vm69_vm0, %v37_v10 }
  0x3c   :  { %290 = vmatprep.mubr.f32.mxu0 %v1255_v0  ;;  %1155 = vmatprep.mubr.msk.f32.mxu1 %vm69_vm0, %v38_v12  ;;  %v655_v12 = vld [vmem:[#allocation3 + $0x38] sm:$0xff] }
  0x3f   :  { %1060 = vmatmul.mubr.msk.f32.gmra.mrb[20].mxu0 %vm69_vm0, %v44_v22  ;;  %1156 = vmatmul.mubr.msk.f32.gmra.mrb[20].mxu1 %vm69_vm0, %v39_v14  ;;  %v727_v14 = vld [vmem:[#allocation3 + $0x278] sm:$0xff] }
  0x40   :  { %296 = vmatprep.mubr.f32.mxu0 %v1255_v0  ;;  %1158 = vmatprep.mubr.msk.f32.mxu1 %vm69_vm0, %v40_v16 }
  0x43   :  { %1061 = vmatmul.mubr.msk.f32.gmra.mrb[22].mxu0 %vm69_vm0, %v45_v23  ;;  %1159 = vmatmul.mubr.msk.f32.gmra.mrb[22].mxu1 %vm69_vm0, %v41_v18 }
  0x44   :  { %302 = vmatprep.mubr.f32.mxu0 %v1255_v0  ;;  %1161 = vmatprep.mubr.msk.f32.mxu1 %vm69_vm0, %v42_v20 }
  0x47   :  { %1062 = vmatmul.mubr.msk.f32.gmra.mrb[24].mxu0 %vm69_vm0, %v46_v24  ;;  %1162 = vmatmul.mubr.msk.f32.gmra.mrb[24].mxu1 %vm69_vm0, %v43_v21 }
  0x48   :  { %308 = vmatprep.mubr.f32.mxu0 %v1255_v0  ;;  %1164 = vmatprep.mubr.msk.f32.mxu1 %vm69_vm0, %v44_v22  ;;  %v657_v22 = vld [vmem:[#allocation3 + $0x48] sm:$0xff] }
  0x4b   :  { %1063 = vmatmul.mubr.msk.f32.gmra.mrb[26].mxu0 %vm69_vm0, %v47_v25  ;;  %1165 = vmatmul.mubr.msk.f32.gmra.mrb[26].mxu1 %vm69_vm0, %v45_v23 }
  0x4c   :  { %314 = vmatprep.mubr.f32.mxu0 %v1255_v0  ;;  %1167 = vmatprep.mubr.msk.f32.mxu1 %vm69_vm0, %v46_v24  ;;  %v729_v24 = vld [vmem:[#allocation3 + $0x288] sm:$0xff] }
  0x4f   :  { %1064 = vmatmul.mubr.msk.f32.gmra.mrb[28].mxu0 %vm69_vm0, %v48_v26  ;;  %1168 = vmatmul.mubr.msk.f32.gmra.mrb[28].mxu1 %vm69_vm0, %v47_v25 }
  0x50   :  { %320 = vmatprep.mubr.f32.mxu0 %v1255_v0  ;;  %1170 = vmatprep.mubr.msk.f32.mxu1 %vm69_vm0, %v48_v26 }
  0x53   :  { %1065 = vmatmul.mubr.msk.f32.gmra.mrb[30].mxu0 %vm69_vm0, %v49_v27  ;;  %1171 = vmatmul.mubr.msk.f32.gmra.mrb[30].mxu1 %vm69_vm0, %v49_v27 }
  0x54   :  { %326 = vmatprep.mubr.f32.mxu0 %v1255_v0  ;;  %1173 = vmatprep.mubr.msk.f32.mxu1 %vm69_vm0, %v50_v28 }
  0x57   :  { %1066 = vmatmul.mubr.msk.f32.gmra.mrb[32].mxu0 %vm69_vm0, %v50_v28  ;;  %1174 = vmatmul.mubr.msk.f32.gmra.mrb[32].mxu1 %vm69_vm0, %v51_v29  ;;  %v658_v28 = vld [vmem:[#allocation3 + $0x50] sm:$0xff] }
  0x58   :  { %332 = vmatprep.mubr.f32.mxu0 %v1255_v0  ;;  %1176 = vmatprep.mubr.msk.f32.mxu1 %vm69_vm0, %v52_v30 }
  0x5b   :  { %1067 = vmatmul.mubr.msk.f32.gmra.mrb[34].mxu0 %vm69_vm0, %v51_v29  ;;  %1177 = vmatmul.mubr.msk.f32.gmra.mrb[34].mxu1 %vm69_vm0, %v53_v31 }
  0x5c   :  { %338 = vmatprep.mubr.f32.mxu0 %v1255_v0  ;;  %1179 = vmatprep.mubr.msk.f32.mxu1 %vm69_vm0, %v54_v32 }
  0x5f   :  { %1068 = vmatmul.mubr.msk.f32.gmra.mrb[36].mxu0 %vm69_vm0, %v52_v30  ;;  %1180 = vmatmul.mubr.msk.f32.gmra.mrb[36].mxu1 %vm69_vm0, %v55_v33  ;;  %v730_v30 = vld [vmem:[#allocation3 + $0x290] sm:$0xff] }
  0x60   :  { %344 = vmatprep.mubr.f32.mxu0 %v1255_v0  ;;  %1182 = vmatprep.mubr.msk.f32.mxu1 %vm69_vm0, %v56_v34 }
  0x63   :  { %1069 = vmatmul.mubr.msk.f32.gmra.mrb[38].mxu0 %vm69_vm0, %v53_v31  ;;  %1183 = vmatmul.mubr.msk.f32.gmra.mrb[38].mxu1 %vm69_vm0, %v57_v35 }
  0x64   :  { %350 = vmatprep.mubr.f32.mxu0 %v1255_v0  ;;  %1185 = vmatprep.mubr.msk.f32.mxu1 %vm69_vm0, %v1311_v4 }
  0x67   :  { %1070 = vmatmul.mubr.msk.f32.gmra.mrb[40].mxu0 %vm69_vm0, %v54_v32  ;;  %1186 = vmatmul.mubr.msk.f32.gmra.mrb[40].mxu1 %vm69_vm0, %v1326_v7 }
  0x68   :  { %356 = vmatprep.mubr.f32.mxu0 %v1255_v0  ;;  %1188 = vmatprep.mubr.msk.f32.mxu1 %vm69_vm0, %v1340_v9 }
  0x6b   :  { %1071 = vmatmul.mubr.msk.f32.gmra.mrb[42].mxu0 %vm69_vm0, %v55_v33  ;;  %1189 = vmatmul.mubr.msk.f32.gmra.mrb[42].mxu1 %vm69_vm0, %v1353_v11 }
  0x6c   :  { %362 = vmatprep.mubr.f32.mxu0 %v1255_v0  ;;  %1191 = vmatprep.mubr.msk.f32.mxu1 %vm69_vm0, %v1366_v13 }
  0x6f   :  { %1072 = vmatmul.mubr.msk.f32.gmra.mrb[44].mxu0 %vm69_vm0, %v56_v34  ;;  %1192 = vmatmul.mubr.msk.f32.gmra.mrb[44].mxu1 %vm69_vm0, %v1379_v15 }
  0x70   :  { %368 = vmatprep.mubr.f32.mxu0 %v1255_v0  ;;  %1194 = vmatprep.mubr.msk.f32.mxu1 %vm69_vm0, %v1392_v17 }
  0x73   :  { %1073 = vmatmul.mubr.msk.f32.gmra.mrb[46].mxu0 %vm69_vm0, %v57_v35  ;;  %1195 = vmatmul.mubr.msk.f32.gmra.mrb[46].mxu1 %vm69_vm0, %v1405_v19 }
  0xea   :  { %v232_v37 = vpop.f32.mrb[0].mxu0  ;;  %v376_v39 = vpop.f32.mrb[0].mxu1 }
  0xeb   :  { %v745_v41 = vmul.f32 %v1533_v36, %v232_v37  ;;  %v817_v42 = vmul.f32 %v1533_v36, %v376_v39  ;;  %v234_v43 = vpop.f32.mrb[1].mxu0  ;;  %v378_v45 = vpop.f32.mrb[1].mxu1  ;;  %v660_v39 = vld [vmem:[#allocation3 + $0x60] sm:$0xff] }
  0xec   :  { %v746_v47 = vmul.f32 %v1533_v36, %v234_v43  ;;  %v818_v48 = vmul.f32 %v1533_v36, %v378_v45  ;;  %v661_v45 = vld [vmem:[#allocation3 + $0x68] sm:$0xff] }
  0xed   :  { %v841_v49 = vadd.f32 %v745_v41, %v648_v38  ;;  %v913_v50 = vadd.f32 %v817_v42, %v720_v40  ;;  %v732_v41 = vld [vmem:[#allocation3 + $0x2a0] sm:$0xff] }
  0xee   :  { %v842_v51 = vadd.f32 %v746_v47, %v649_v44  ;;  %v914_v52 = vadd.f32 %v818_v48, %v721_v46  ;;  %v238_v53 = vpop.f32.mrb[2].mxu0  ;;  %v382_v55 = vpop.f32.mrb[2].mxu1  ;;  %v733_v47 = vld [vmem:[#allocation3 + $0x2a8] sm:$0xff] }
  0xef   :  { %937 = vst [vmem:[#allocation6] sm:$0xff] %v841_v49  ;;  %1009 = vst [vmem:[#allocation6 + $0x240] sm:$0xff] %v913_v50  ;;  %v748_v57 = vmul.f32 %v1533_v36, %v238_v53  ;;  %v820_v58 = vmul.f32 %v1533_v36, %v382_v55  ;;  %v240_v59 = vpop.f32.mrb[3].mxu0  ;;  %v384_v61 = vpop.f32.mrb[3].mxu1  ;;  %v663_v55 = vld [vmem:[#allocation3 + $0x78] sm:$0xff] }
  0xf0   :  { %938 = vst [vmem:[#allocation6 + $0x8] sm:$0xff] %v842_v51  ;;  %1010 = vst [vmem:[#allocation6 + $0x248] sm:$0xff] %v914_v52  ;;  %v749_v63 = vmul.f32 %v1533_v36, %v240_v59  ;;  %v821_v0 = vmul.f32 %v1533_v36, %v384_v61  ;;  %v664_v61 = vld [vmem:[#allocation3 + $0x80] sm:$0xff] }
  0xf1   :  { %v844_v1 = vadd.f32 %v748_v57, %v651_v54  ;;  %v916_v2 = vadd.f32 %v820_v58, %v723_v56  ;;  %v735_v57 = vld [vmem:[#allocation3 + $0x2b8] sm:$0xff] }
  0xf2   :  { %v845_v3 = vadd.f32 %v749_v63, %v652_v60  ;;  %v917_v4 = vadd.f32 %v821_v0, %v724_v62  ;;  %v244_v5 = vpop.f32.mrb[4].mxu0  ;;  %v388_v7 = vpop.f32.mrb[4].mxu1  ;;  %v736_v63 = vld [vmem:[#allocation3 + $0x2c0] sm:$0xff] }
  0xf3   :  { %940 = vst [vmem:[#allocation6 + $0x18] sm:$0xff] %v844_v1  ;;  %1012 = vst [vmem:[#allocation6 + $0x258] sm:$0xff] %v916_v2  ;;  %v751_v9 = vmul.f32 %v1533_v36, %v244_v5  ;;  %v823_v10 = vmul.f32 %v1533_v36, %v388_v7  ;;  %v246_v11 = vpop.f32.mrb[5].mxu0  ;;  %v390_v13 = vpop.f32.mrb[5].mxu1  ;;  %v666_v7 = vld [vmem:[#allocation3 + $0x90] sm:$0xff] }
  0xf4   :  { %941 = vst [vmem:[#allocation6 + $0x20] sm:$0xff] %v845_v3  ;;  %1013 = vst [vmem:[#allocation6 + $0x260] sm:$0xff] %v917_v4  ;;  %v752_v15 = vmul.f32 %v1533_v36, %v246_v11  ;;  %v824_v16 = vmul.f32 %v1533_v36, %v390_v13  ;;  %v667_v13 = vld [vmem:[#allocation3 + $0x98] sm:$0xff] }
  0xf5   :  { %v847_v17 = vadd.f32 %v751_v9, %v654_v6  ;;  %v919_v18 = vadd.f32 %v823_v10, %v726_v8  ;;  %v738_v9 = vld [vmem:[#allocation3 + $0x2d0] sm:$0xff] }
  0xf6   :  { %v848_v19 = vadd.f32 %v752_v15, %v655_v12  ;;  %v920_v20 = vadd.f32 %v824_v16, %v727_v14  ;;  %v250_v21 = vpop.f32.mrb[6].mxu0  ;;  %v394_v23 = vpop.f32.mrb[6].mxu1  ;;  %v739_v15 = vld [vmem:[#allocation3 + $0x2d8] sm:$0xff] }
  0xf7   :  { %943 = vst [vmem:[#allocation6 + $0x30] sm:$0xff] %v847_v17  ;;  %1015 = vst [vmem:[#allocation6 + $0x270] sm:$0xff] %v919_v18  ;;  %v754_v25 = vmul.f32 %v1533_v36, %v250_v21  ;;  %v826_v26 = vmul.f32 %v1533_v36, %v394_v23  ;;  %v252_v27 = vpop.f32.mrb[7].mxu0  ;;  %v396_v29 = vpop.f32.mrb[7].mxu1  ;;  %v669_v23 = vld [vmem:[#allocation3 + $0xa8] sm:$0xff] }
  0xf8   :  { %944 = vst [vmem:[#allocation6 + $0x38] sm:$0xff] %v848_v19  ;;  %1016 = vst [vmem:[#allocation6 + $0x278] sm:$0xff] %v920_v20  ;;  %v755_v31 = vmul.f32 %v1533_v36, %v252_v27  ;;  %v827_v32 = vmul.f32 %v1533_v36, %v396_v29  ;;  %v670_v29 = vld [vmem:[#allocation3 + $0xb0] sm:$0xff] }
  0xf9   :  { %v850_v33 = vadd.f32 %v754_v25, %v657_v22  ;;  %v922_v34 = vadd.f32 %v826_v26, %v729_v24  ;;  %v741_v25 = vld [vmem:[#allocation3 + $0x2e8] sm:$0xff] }
  0xfa   :  { %v851_v35 = vadd.f32 %v755_v31, %v658_v28  ;;  %v923_v37 = vadd.f32 %v827_v32, %v730_v30  ;;  %v256_v38 = vpop.f32.mrb[8].mxu0  ;;  %v400_v40 = vpop.f32.mrb[8].mxu1  ;;  %v742_v31 = vld [vmem:[#allocation3 + $0x2f0] sm:$0xff] }
  0xfb   :  { %946 = vst [vmem:[#allocation6 + $0x48] sm:$0xff] %v850_v33  ;;  %1018 = vst [vmem:[#allocation6 + $0x288] sm:$0xff] %v922_v34  ;;  %v757_v42 = vmul.f32 %v1533_v36, %v256_v38  ;;  %v829_v43 = vmul.f32 %v1533_v36, %v400_v40  ;;  %v258_v44 = vpop.f32.mrb[9].mxu0  ;;  %v402_v46 = vpop.f32.mrb[9].mxu1  ;;  %v672_v40 = vld [vmem:[#allocation3 + $0xc0] sm:$0xff] }
  0xfc   :  { %947 = vst [vmem:[#allocation6 + $0x50] sm:$0xff] %v851_v35  ;;  %1019 = vst [vmem:[#allocation6 + $0x290] sm:$0xff] %v923_v37  ;;  %v758_v48 = vmul.f32 %v1533_v36, %v258_v44  ;;  %v830_v49 = vmul.f32 %v1533_v36, %v402_v46  ;;  %v673_v46 = vld [vmem:[#allocation3 + $0xc8] sm:$0xff] }
  0xfd   :  { %v853_v50 = vadd.f32 %v757_v42, %v660_v39  ;;  %v925_v51 = vadd.f32 %v829_v43, %v732_v41  ;;  %v653_v42 = vld [vmem:[#allocation3 + $0x28] sm:$0xff] }
  0xfe   :  { %v854_v52 = vadd.f32 %v758_v48, %v661_v45  ;;  %v926_v53 = vadd.f32 %v830_v49, %v733_v47  ;;  %v262_v54 = vpop.f32.mrb[10].mxu0  ;;  %v406_v56 = vpop.f32.mrb[10].mxu1  ;;  %v650_v48 = vld [vmem:[#allocation3 + $0x10] sm:$0xff] }
  0xff   :  { %949 = vst [vmem:[#allocation6 + $0x60] sm:$0xff] %v853_v50  ;;  %1021 = vst [vmem:[#allocation6 + $0x2a0] sm:$0xff] %v925_v51  ;;  %v760_v58 = vmul.f32 %v1533_v36, %v262_v54  ;;  %v832_v59 = vmul.f32 %v1533_v36, %v406_v56  ;;  %v264_v60 = vpop.f32.mrb[11].mxu0  ;;  %v408_v62 = vpop.f32.mrb[11].mxu1  ;;  %v675_v56 = vld [vmem:[#allocation3 + $0xd8] sm:$0xff] }
 0x100   :  { %950 = vst [vmem:[#allocation6 + $0x68] sm:$0xff] %v854_v52  ;;  %1022 = vst [vmem:[#allocation6 + $0x2a8] sm:$0xff] %v926_v53  ;;  %v761_v0 = vmul.f32 %v1533_v36, %v264_v60  ;;  %v833_v1 = vmul.f32 %v1533_v36, %v408_v62  ;;  %v676_v62 = vld [vmem:[#allocation3 + $0xe0] sm:$0xff] }
 0x101   :  { %v856_v2 = vadd.f32 %v760_v58, %v663_v55  ;;  %v928_v3 = vadd.f32 %v832_v59, %v735_v57  ;;  %v659_v58 = vld [vmem:[#allocation3 + $0x58] sm:$0xff] }
 0x102   :  { %v857_v4 = vadd.f32 %v761_v0, %v664_v61  ;;  %v929_v5 = vadd.f32 %v833_v1, %v736_v63  ;;  %v268_v6 = vpop.f32.mrb[12].mxu0  ;;  %v412_v8 = vpop.f32.mrb[12].mxu1  ;;  %v656_v0 = vld [vmem:[#allocation3 + $0x40] sm:$0xff] }
 0x103   :  { %952 = vst [vmem:[#allocation6 + $0x78] sm:$0xff] %v856_v2  ;;  %1024 = vst [vmem:[#allocation6 + $0x2b8] sm:$0xff] %v928_v3  ;;  %v763_v10 = vmul.f32 %v1533_v36, %v268_v6  ;;  %v835_v11 = vmul.f32 %v1533_v36, %v412_v8  ;;  %v270_v12 = vpop.f32.mrb[13].mxu0  ;;  %v414_v14 = vpop.f32.mrb[13].mxu1  ;;  %v678_v8 = vld [vmem:[#allocation3 + $0xf0] sm:$0xff] }
 0x104   :  { %953 = vst [vmem:[#allocation6 + $0x80] sm:$0xff] %v857_v4  ;;  %1025 = vst [vmem:[#allocation6 + $0x2c0] sm:$0xff] %v929_v5  ;;  %v764_v16 = vmul.f32 %v1533_v36, %v270_v12  ;;  %v836_v17 = vmul.f32 %v1533_v36, %v414_v14  ;;  %v679_v14 = vld [vmem:[#allocation3 + $0xf8] sm:$0xff] }
 0x105   :  { %v859_v18 = vadd.f32 %v763_v10, %v666_v7  ;;  %v931_v19 = vadd.f32 %v835_v11, %v738_v9  ;;  %v665_v10 = vld [vmem:[#allocation3 + $0x88] sm:$0xff] }
 0x106   :  { %v860_v20 = vadd.f32 %v764_v16, %v667_v13  ;;  %v932_v21 = vadd.f32 %v836_v17, %v739_v15  ;;  %v274_v22 = vpop.f32.mrb[14].mxu0  ;;  %v418_v24 = vpop.f32.mrb[14].mxu1  ;;  %v662_v16 = vld [vmem:[#allocation3 + $0x70] sm:$0xff] }
 0x107   :  { %955 = vst [vmem:[#allocation6 + $0x90] sm:$0xff] %v859_v18  ;;  %1027 = vst [vmem:[#allocation6 + $0x2d0] sm:$0xff] %v931_v19  ;;  %v766_v26 = vmul.f32 %v1533_v36, %v274_v22  ;;  %v838_v27 = vmul.f32 %v1533_v36, %v418_v24  ;;  %v276_v28 = vpop.f32.mrb[15].mxu0  ;;  %v420_v30 = vpop.f32.mrb[15].mxu1  ;;  %v681_v24 = vld [vmem:[#allocation3 + $0x108] sm:$0xff] }
 0x108   :  { %956 = vst [vmem:[#allocation6 + $0x98] sm:$0xff] %v860_v20  ;;  %1028 = vst [vmem:[#allocation6 + $0x2d8] sm:$0xff] %v932_v21  ;;  %v767_v32 = vmul.f32 %v1533_v36, %v276_v28  ;;  %v839_v33 = vmul.f32 %v1533_v36, %v420_v30  ;;  %v682_v30 = vld [vmem:[#allocation3 + $0x110] sm:$0xff] }
 0x109   :  { %v862_v34 = vadd.f32 %v766_v26, %v669_v23  ;;  %v934_v35 = vadd.f32 %v838_v27, %v741_v25  ;;  %v671_v26 = vld [vmem:[#allocation3 + $0xb8] sm:$0xff] }
 0x10a   :  { %v863_v37 = vadd.f32 %v767_v32, %v670_v29  ;;  %v935_v38 = vadd.f32 %v839_v33, %v742_v31  ;;  %v280_v39 = vpop.f32.mrb[16].mxu0  ;;  %v1151_v41 = vpop.f32.mrb[16].mxu1  ;;  %v668_v32 = vld [vmem:[#allocation3 + $0xa0] sm:$0xff] }
 0x10b   :  { %958 = vst [vmem:[#allocation6 + $0xa8] sm:$0xff] %v862_v34  ;;  %1030 = vst [vmem:[#allocation6 + $0x2e8] sm:$0xff] %v934_v35  ;;  %v769_v43 = vmul.f32 %v1533_v36, %v280_v39  ;;  %v750_v44 = vmul.f32 %v1151_v41, %v1533_v36  ;;  %v282_v45 = vpop.f32.mrb[17].mxu0  ;;  %v489_v47 = vpop.f32.mrb[17].mxu1  ;;  %v684_v41 = vld [vmem:[#allocation3 + $0x120] sm:$0xff] }
 0x10c   :  { %959 = vst [vmem:[#allocation6 + $0xb0] sm:$0xff] %v863_v37  ;;  %1031 = vst [vmem:[#allocation6 + $0x2f0] sm:$0xff] %v935_v38  ;;  %v770_v49 = vmul.f32 %v1533_v36, %v282_v45  ;;  %v747_v50 = vmul.f32 %v1533_v36, %v489_v47  ;;  %v685_v47 = vld [vmem:[#allocation3 + $0x128] sm:$0xff] }
 0x10d   :  { %v865_v51 = vadd.f32 %v769_v43, %v672_v40  ;;  %v846_v52 = vadd.f32 %v750_v44, %v653_v42  ;;  %v677_v43 = vld [vmem:[#allocation3 + $0xe8] sm:$0xff] }
 0x10e   :  { %v866_v53 = vadd.f32 %v770_v49, %v673_v46  ;;  %v843_v54 = vadd.f32 %v747_v50, %v650_v48  ;;  %v286_v55 = vpop.f32.mrb[18].mxu0  ;;  %v1154_v57 = vpop.f32.mrb[18].mxu1  ;;  %v674_v49 = vld [vmem:[#allocation3 + $0xd0] sm:$0xff] }
 0x10f   :  { %961 = vst [vmem:[#allocation6 + $0xc0] sm:$0xff] %v865_v51  ;;  %942 = vst [vmem:[#allocation6 + $0x28] sm:$0xff] %v846_v52  ;;  %v772_v59 = vmul.f32 %v1533_v36, %v286_v55  ;;  %v756_v60 = vmul.f32 %v1154_v57, %v1533_v36  ;;  %v288_v61 = vpop.f32.mrb[19].mxu0  ;;  %v499_v63 = vpop.f32.mrb[19].mxu1  ;;  %v687_v57 = vld [vmem:[#allocation3 + $0x138] sm:$0xff] }
 0x110   :  { %962 = vst [vmem:[#allocation6 + $0xc8] sm:$0xff] %v866_v53  ;;  %939 = vst [vmem:[#allocation6 + $0x10] sm:$0xff] %v843_v54  ;;  %v773_v1 = vmul.f32 %v1533_v36, %v288_v61  ;;  %v753_v2 = vmul.f32 %v1533_v36, %v499_v63  ;;  %v688_v63 = vld [vmem:[#allocation3 + $0x140] sm:$0xff] }
 0x111   :  { %v868_v3 = vadd.f32 %v772_v59, %v675_v56  ;;  %v852_v4 = vadd.f32 %v756_v60, %v659_v58  ;;  %v683_v59 = vld [vmem:[#allocation3 + $0x118] sm:$0xff] }
 0x112   :  { %v869_v5 = vadd.f32 %v773_v1, %v676_v62  ;;  %v849_v6 = vadd.f32 %v753_v2, %v656_v0  ;;  %v292_v7 = vpop.f32.mrb[20].mxu0  ;;  %v1157_v9 = vpop.f32.mrb[20].mxu1  ;;  %v680_v1 = vld [vmem:[#allocation3 + $0x100] sm:$0xff] }
 0x113   :  { %964 = vst [vmem:[#allocation6 + $0xd8] sm:$0xff] %v868_v3  ;;  %948 = vst [vmem:[#allocation6 + $0x58] sm:$0xff] %v852_v4  ;;  %v775_v11 = vmul.f32 %v1533_v36, %v292_v7  ;;  %v762_v12 = vmul.f32 %v1157_v9, %v1533_v36  ;;  %v294_v13 = vpop.f32.mrb[21].mxu0  ;;  %v509_v15 = vpop.f32.mrb[21].mxu1  ;;  %v690_v9 = vld [vmem:[#allocation3 + $0x150] sm:$0xff] }
 0x114   :  { %965 = vst [vmem:[#allocation6 + $0xe0] sm:$0xff] %v869_v5  ;;  %945 = vst [vmem:[#allocation6 + $0x40] sm:$0xff] %v849_v6  ;;  %v776_v17 = vmul.f32 %v1533_v36, %v294_v13  ;;  %v759_v18 = vmul.f32 %v1533_v36, %v509_v15  ;;  %v691_v15 = vld [vmem:[#allocation3 + $0x158] sm:$0xff] }
 0x115   :  { %v871_v19 = vadd.f32 %v775_v11, %v678_v8  ;;  %v858_v20 = vadd.f32 %v762_v12, %v665_v10  ;;  %v689_v11 = vld [vmem:[#allocation3 + $0x148] sm:$0xff] }
 0x116   :  { %v872_v21 = vadd.f32 %v776_v17, %v679_v14  ;;  %v855_v22 = vadd.f32 %v759_v18, %v662_v16  ;;  %v298_v23 = vpop.f32.mrb[22].mxu0  ;;  %v1160_v25 = vpop.f32.mrb[22].mxu1  ;;  %v686_v17 = vld [vmem:[#allocation3 + $0x130] sm:$0xff] }
 0x117   :  { %967 = vst [vmem:[#allocation6 + $0xf0] sm:$0xff] %v871_v19  ;;  %954 = vst [vmem:[#allocation6 + $0x88] sm:$0xff] %v858_v20  ;;  %v778_v27 = vmul.f32 %v1533_v36, %v298_v23  ;;  %v768_v28 = vmul.f32 %v1160_v25, %v1533_v36  ;;  %v300_v29 = vpop.f32.mrb[23].mxu0  ;;  %v519_v31 = vpop.f32.mrb[23].mxu1  ;;  %v693_v25 = vld [vmem:[#allocation3 + $0x168] sm:$0xff] }
 0x118   :  { %968 = vst [vmem:[#allocation6 + $0xf8] sm:$0xff] %v872_v21  ;;  %951 = vst [vmem:[#allocation6 + $0x70] sm:$0xff] %v855_v22  ;;  %v779_v33 = vmul.f32 %v1533_v36, %v300_v29  ;;  %v765_v34 = vmul.f32 %v1533_v36, %v519_v31  ;;  %v694_v31 = vld [vmem:[#allocation3 + $0x170] sm:$0xff] }
 0x119   :  { %v874_v35 = vadd.f32 %v778_v27, %v681_v24  ;;  %v864_v37 = vadd.f32 %v768_v28, %v671_v26  ;;  %v695_v27 = vld [vmem:[#allocation3 + $0x178] sm:$0xff] }
 0x11a   :  { %v875_v38 = vadd.f32 %v779_v33, %v682_v30  ;;  %v861_v39 = vadd.f32 %v765_v34, %v668_v32  ;;  %v304_v40 = vpop.f32.mrb[24].mxu0  ;;  %v1163_v42 = vpop.f32.mrb[24].mxu1  ;;  %v692_v33 = vld [vmem:[#allocation3 + $0x160] sm:$0xff] }
 0x11b   :  { %970 = vst [vmem:[#allocation6 + $0x108] sm:$0xff] %v874_v35  ;;  %960 = vst [vmem:[#allocation6 + $0xb8] sm:$0xff] %v864_v37  ;;  %v781_v44 = vmul.f32 %v1533_v36, %v304_v40  ;;  %v774_v45 = vmul.f32 %v1163_v42, %v1533_v36  ;;  %v306_v46 = vpop.f32.mrb[25].mxu0  ;;  %v529_v48 = vpop.f32.mrb[25].mxu1  ;;  %v696_v42 = vld [vmem:[#allocation3 + $0x180] sm:$0xff] }
 0x11c   :  { %971 = vst [vmem:[#allocation6 + $0x110] sm:$0xff] %v875_v38  ;;  %957 = vst [vmem:[#allocation6 + $0xa0] sm:$0xff] %v861_v39  ;;  %v782_v50 = vmul.f32 %v1533_v36, %v306_v46  ;;  %v771_v51 = vmul.f32 %v1533_v36, %v529_v48  ;;  %v697_v48 = vld [vmem:[#allocation3 + $0x188] sm:$0xff] }
 0x11d   :  { %v877_v52 = vadd.f32 %v781_v44, %v684_v41  ;;  %v870_v53 = vadd.f32 %v774_v45, %v677_v43  ;;  %v701_v44 = vld [vmem:[#allocation3 + $0x1a8] sm:$0xff] }
 0x11e   :  { %v878_v54 = vadd.f32 %v782_v50, %v685_v47  ;;  %v867_v55 = vadd.f32 %v771_v51, %v674_v49  ;;  %v310_v56 = vpop.f32.mrb[26].mxu0  ;;  %v1166_v58 = vpop.f32.mrb[26].mxu1  ;;  %v698_v50 = vld [vmem:[#allocation3 + $0x190] sm:$0xff] }
 0x11f   :  { %973 = vst [vmem:[#allocation6 + $0x120] sm:$0xff] %v877_v52  ;;  %966 = vst [vmem:[#allocation6 + $0xe8] sm:$0xff] %v870_v53  ;;  %v784_v60 = vmul.f32 %v1533_v36, %v310_v56  ;;  %v780_v61 = vmul.f32 %v1166_v58, %v1533_v36  ;;  %v312_v62 = vpop.f32.mrb[27].mxu0  ;;  %v539_v0 = vpop.f32.mrb[27].mxu1  ;;  %v699_v58 = vld [vmem:[#allocation3 + $0x198] sm:$0xff] }
 0x120   :  { %974 = vst [vmem:[#allocation6 + $0x128] sm:$0xff] %v878_v54  ;;  %963 = vst [vmem:[#allocation6 + $0xd0] sm:$0xff] %v867_v55  ;;  %v785_v2 = vmul.f32 %v1533_v36, %v312_v62  ;;  %v777_v3 = vmul.f32 %v1533_v36, %v539_v0  ;;  %v700_v0 = vld [vmem:[#allocation3 + $0x1a0] sm:$0xff] }
 0x121   :  { %v880_v4 = vadd.f32 %v784_v60, %v687_v57  ;;  %v876_v5 = vadd.f32 %v780_v61, %v683_v59  ;;  %v707_v60 = vld [vmem:[#allocation3 + $0x1d8] sm:$0xff] }
 0x122   :  { %v881_v6 = vadd.f32 %v785_v2, %v688_v63  ;;  %v873_v7 = vadd.f32 %v777_v3, %v680_v1  ;;  %v316_v8 = vpop.f32.mrb[28].mxu0  ;;  %v1169_v10 = vpop.f32.mrb[28].mxu1  ;;  %v704_v2 = vld [vmem:[#allocation3 + $0x1c0] sm:$0xff] }
 0x123   :  { %976 = vst [vmem:[#allocation6 + $0x138] sm:$0xff] %v880_v4  ;;  %972 = vst [vmem:[#allocation6 + $0x118] sm:$0xff] %v876_v5  ;;  %v787_v12 = vmul.f32 %v1533_v36, %v316_v8  ;;  %v786_v13 = vmul.f32 %v1169_v10, %v1533_v36  ;;  %v318_v14 = vpop.f32.mrb[29].mxu0  ;;  %v549_v16 = vpop.f32.mrb[29].mxu1  ;;  %v702_v10 = vld [vmem:[#allocation3 + $0x1b0] sm:$0xff] }
 0x124   :  { %977 = vst [vmem:[#allocation6 + $0x140] sm:$0xff] %v881_v6  ;;  %969 = vst [vmem:[#allocation6 + $0x100] sm:$0xff] %v873_v7  ;;  %v788_v18 = vmul.f32 %v1533_v36, %v318_v14  ;;  %v783_v19 = vmul.f32 %v1533_v36, %v549_v16  ;;  %v703_v16 = vld [vmem:[#allocation3 + $0x1b8] sm:$0xff] }
 0x125   :  { %v883_v20 = vadd.f32 %v787_v12, %v690_v9  ;;  %v882_v21 = vadd.f32 %v786_v13, %v689_v11  ;;  %v713_v12 = vld [vmem:[#allocation3 + $0x208] sm:$0xff] }
 0x126   :  { %v884_v22 = vadd.f32 %v788_v18, %v691_v15  ;;  %v879_v23 = vadd.f32 %v783_v19, %v686_v17  ;;  %v322_v24 = vpop.f32.mrb[30].mxu0  ;;  %v1172_v26 = vpop.f32.mrb[30].mxu1  ;;  %v710_v18 = vld [vmem:[#allocation3 + $0x1f0] sm:$0xff] }
 0x127   :  { %979 = vst [vmem:[#allocation6 + $0x150] sm:$0xff] %v883_v20  ;;  %978 = vst [vmem:[#allocation6 + $0x148] sm:$0xff] %v882_v21  ;;  %v790_v28 = vmul.f32 %v1533_v36, %v322_v24  ;;  %v792_v29 = vmul.f32 %v1172_v26, %v1533_v36  ;;  %v324_v30 = vpop.f32.mrb[31].mxu0  ;;  %v559_v32 = vpop.f32.mrb[31].mxu1  ;;  %v705_v26 = vld [vmem:[#allocation3 + $0x1c8] sm:$0xff] }
 0x128   :  { %980 = vst [vmem:[#allocation6 + $0x158] sm:$0xff] %v884_v22  ;;  %975 = vst [vmem:[#allocation6 + $0x130] sm:$0xff] %v879_v23  ;;  %v791_v34 = vmul.f32 %v1533_v36, %v324_v30  ;;  %v789_v35 = vmul.f32 %v1533_v36, %v559_v32  ;;  %v706_v32 = vld [vmem:[#allocation3 + $0x1d0] sm:$0xff] }
 0x129   :  { %v886_v37 = vadd.f32 %v790_v28, %v693_v25  ;;  %v888_v38 = vadd.f32 %v792_v29, %v695_v27  ;;  %v719_v28 = vld [vmem:[#allocation3 + $0x238] sm:$0xff] }
 0x12a   :  { %v887_v39 = vadd.f32 %v791_v34, %v694_v31  ;;  %v885_v40 = vadd.f32 %v789_v35, %v692_v33  ;;  %v328_v41 = vpop.f32.mrb[32].mxu0  ;;  %v1175_v43 = vpop.f32.mrb[32].mxu1  ;;  %v716_v34 = vld [vmem:[#allocation3 + $0x220] sm:$0xff] }
 0x12b   :  { %982 = vst [vmem:[#allocation6 + $0x168] sm:$0xff] %v886_v37  ;;  %984 = vst [vmem:[#allocation6 + $0x178] sm:$0xff] %v888_v38  ;;  %v793_v45 = vmul.f32 %v1533_v36, %v328_v41  ;;  %v798_v46 = vmul.f32 %v1175_v43, %v1533_v36  ;;  %v330_v47 = vpop.f32.mrb[33].mxu0  ;;  %v569_v49 = vpop.f32.mrb[33].mxu1  ;;  %v708_v43 = vld [vmem:[#allocation3 + $0x1e0] sm:$0xff] }
 0x12c   :  { %983 = vst [vmem:[#allocation6 + $0x170] sm:$0xff] %v887_v39  ;;  %981 = vst [vmem:[#allocation6 + $0x160] sm:$0xff] %v885_v40  ;;  %v794_v51 = vmul.f32 %v1533_v36, %v330_v47  ;;  %v795_v52 = vmul.f32 %v1533_v36, %v569_v49  ;;  %v709_v49 = vld [vmem:[#allocation3 + $0x1e8] sm:$0xff] }
 0x12d   :  { %v889_v53 = vadd.f32 %v793_v45, %v696_v42  ;;  %v894_v54 = vadd.f32 %v798_v46, %v701_v44  ;;  %v725_v45 = vld [vmem:[#allocation3 + $0x268] sm:$0xff] }
 0x12e   :  { %v890_v55 = vadd.f32 %v794_v51, %v697_v48  ;;  %v891_v56 = vadd.f32 %v795_v52, %v698_v50  ;;  %v334_v57 = vpop.f32.mrb[34].mxu0  ;;  %v1178_v59 = vpop.f32.mrb[34].mxu1  ;;  %v722_v51 = vld [vmem:[#allocation3 + $0x250] sm:$0xff] }
 0x12f   :  { %985 = vst [vmem:[#allocation6 + $0x180] sm:$0xff] %v889_v53  ;;  %990 = vst [vmem:[#allocation6 + $0x1a8] sm:$0xff] %v894_v54  ;;  %v796_v61 = vmul.f32 %v1533_v36, %v334_v57  ;;  %v804_v62 = vmul.f32 %v1178_v59, %v1533_v36  ;;  %v336_v63 = vpop.f32.mrb[35].mxu0  ;;  %v579_v1 = vpop.f32.mrb[35].mxu1  ;;  %v711_v59 = vld [vmem:[#allocation3 + $0x1f8] sm:$0xff] }
 0x130   :  { %986 = vst [vmem:[#allocation6 + $0x188] sm:$0xff] %v890_v55  ;;  %987 = vst [vmem:[#allocation6 + $0x190] sm:$0xff] %v891_v56  ;;  %v797_v3 = vmul.f32 %v1533_v36, %v336_v63  ;;  %v801_v4 = vmul.f32 %v1533_v36, %v579_v1  ;;  %v712_v1 = vld [vmem:[#allocation3 + $0x200] sm:$0xff] }
 0x131   :  { %v892_v5 = vadd.f32 %v796_v61, %v699_v58  ;;  %v900_v6 = vadd.f32 %v804_v62, %v707_v60  ;;  %v731_v61 = vld [vmem:[#allocation3 + $0x298] sm:$0xff] }
 0x132   :  { %v893_v7 = vadd.f32 %v797_v3, %v700_v0  ;;  %v897_v8 = vadd.f32 %v801_v4, %v704_v2  ;;  %v340_v9 = vpop.f32.mrb[36].mxu0  ;;  %v1181_v11 = vpop.f32.mrb[36].mxu1  ;;  %v728_v3 = vld [vmem:[#allocation3 + $0x280] sm:$0xff] }
 0x133   :  { %988 = vst [vmem:[#allocation6 + $0x198] sm:$0xff] %v892_v5  ;;  %996 = vst [vmem:[#allocation6 + $0x1d8] sm:$0xff] %v900_v6  ;;  %v799_v13 = vmul.f32 %v1533_v36, %v340_v9  ;;  %v810_v14 = vmul.f32 %v1181_v11, %v1533_v36  ;;  %v342_v15 = vpop.f32.mrb[37].mxu0  ;;  %v589_v17 = vpop.f32.mrb[37].mxu1  ;;  %v714_v11 = vld [vmem:[#allocation3 + $0x210] sm:$0xff] }
 0x134   :  { %989 = vst [vmem:[#allocation6 + $0x1a0] sm:$0xff] %v893_v7  ;;  %993 = vst [vmem:[#allocation6 + $0x1c0] sm:$0xff] %v897_v8  ;;  %v800_v19 = vmul.f32 %v1533_v36, %v342_v15  ;;  %v807_v20 = vmul.f32 %v1533_v36, %v589_v17  ;;  %v715_v17 = vld [vmem:[#allocation3 + $0x218] sm:$0xff] }
 0x135   :  { %v895_v21 = vadd.f32 %v799_v13, %v702_v10  ;;  %v906_v22 = vadd.f32 %v810_v14, %v713_v12  ;;  %v737_v13 = vld [vmem:[#allocation3 + $0x2c8] sm:$0xff] }
 0x136   :  { %v896_v23 = vadd.f32 %v800_v19, %v703_v16  ;;  %v903_v24 = vadd.f32 %v807_v20, %v710_v18  ;;  %v346_v25 = vpop.f32.mrb[38].mxu0  ;;  %v1184_v27 = vpop.f32.mrb[38].mxu1  ;;  %v734_v19 = vld [vmem:[#allocation3 + $0x2b0] sm:$0xff] }
 0x137   :  { %991 = vst [vmem:[#allocation6 + $0x1b0] sm:$0xff] %v895_v21  ;;  %1002 = vst [vmem:[#allocation6 + $0x208] sm:$0xff] %v906_v22  ;;  %v802_v29 = vmul.f32 %v1533_v36, %v346_v25  ;;  %v816_v30 = vmul.f32 %v1184_v27, %v1533_v36  ;;  %v348_v31 = vpop.f32.mrb[39].mxu0  ;;  %v599_v33 = vpop.f32.mrb[39].mxu1  ;;  %v717_v27 = vld [vmem:[#allocation3 + $0x228] sm:$0xff] }
 0x138   :  { %992 = vst [vmem:[#allocation6 + $0x1b8] sm:$0xff] %v896_v23  ;;  %999 = vst [vmem:[#allocation6 + $0x1f0] sm:$0xff] %v903_v24  ;;  %v803_v35 = vmul.f32 %v1533_v36, %v348_v31  ;;  %v813_v37 = vmul.f32 %v1533_v36, %v599_v33  ;;  %v718_v33 = vld [vmem:[#allocation3 + $0x230] sm:$0xff] }
 0x139   :  { %v898_v38 = vadd.f32 %v802_v29, %v705_v26  ;;  %v912_v39 = vadd.f32 %v816_v30, %v719_v28  ;;  %v743_v29 = vld [vmem:[#allocation3 + $0x2f8] sm:$0xff] }
 0x13a   :  { %v899_v40 = vadd.f32 %v803_v35, %v706_v32  ;;  %v909_v41 = vadd.f32 %v813_v37, %v716_v34  ;;  %v352_v42 = vpop.f32.mrb[40].mxu0  ;;  %v1187_v44 = vpop.f32.mrb[40].mxu1  ;;  %v740_v35 = vld [vmem:[#allocation3 + $0x2e0] sm:$0xff] }
 0x13b   :  { %994 = vst [vmem:[#allocation6 + $0x1c8] sm:$0xff] %v898_v38  ;;  %1008 = vst [vmem:[#allocation6 + $0x238] sm:$0xff] %v912_v39  ;;  %v805_v46 = vmul.f32 %v1533_v36, %v352_v42  ;;  %v822_v47 = vmul.f32 %v1187_v44, %v1533_v36  ;;  %v354_v48 = vpop.f32.mrb[41].mxu0  ;;  %v609_v50 = vpop.f32.mrb[41].mxu1 }
 0x13c   :  { %995 = vst [vmem:[#allocation6 + $0x1d0] sm:$0xff] %v899_v40  ;;  %1005 = vst [vmem:[#allocation6 + $0x220] sm:$0xff] %v909_v41  ;;  %v806_v52 = vmul.f32 %v1533_v36, %v354_v48  ;;  %v819_v53 = vmul.f32 %v1533_v36, %v609_v50 }
 0x13d   :  { %v901_v54 = vadd.f32 %v805_v46, %v708_v43  ;;  %v918_v55 = vadd.f32 %v822_v47, %v725_v45 }
 0x13e   :  { %v902_v56 = vadd.f32 %v806_v52, %v709_v49  ;;  %v915_v57 = vadd.f32 %v819_v53, %v722_v51  ;;  %v358_v58 = vpop.f32.mrb[42].mxu0  ;;  %v1190_v60 = vpop.f32.mrb[42].mxu1 }
 0x13f   :  { %997 = vst [vmem:[#allocation6 + $0x1e0] sm:$0xff] %v901_v54  ;;  %1014 = vst [vmem:[#allocation6 + $0x268] sm:$0xff] %v918_v55  ;;  %v808_v62 = vmul.f32 %v1533_v36, %v358_v58  ;;  %v828_v63 = vmul.f32 %v1190_v60, %v1533_v36  ;;  %v360_v0 = vpop.f32.mrb[43].mxu0  ;;  %v619_v2 = vpop.f32.mrb[43].mxu1 }
 0x140   :  { %998 = vst [vmem:[#allocation6 + $0x1e8] sm:$0xff] %v902_v56  ;;  %1011 = vst [vmem:[#allocation6 + $0x250] sm:$0xff] %v915_v57  ;;  %v809_v4 = vmul.f32 %v1533_v36, %v360_v0  ;;  %v825_v5 = vmul.f32 %v1533_v36, %v619_v2 }
 0x141   :  { %v904_v6 = vadd.f32 %v808_v62, %v711_v59  ;;  %v924_v7 = vadd.f32 %v828_v63, %v731_v61 }
 0x142   :  { %v905_v8 = vadd.f32 %v809_v4, %v712_v1  ;;  %v921_v9 = vadd.f32 %v825_v5, %v728_v3  ;;  %v364_v10 = vpop.f32.mrb[44].mxu0  ;;  %v1193_v12 = vpop.f32.mrb[44].mxu1 }
 0x143   :  { %1000 = vst [vmem:[#allocation6 + $0x1f8] sm:$0xff] %v904_v6  ;;  %1020 = vst [vmem:[#allocation6 + $0x298] sm:$0xff] %v924_v7  ;;  %v811_v14 = vmul.f32 %v1533_v36, %v364_v10  ;;  %v834_v15 = vmul.f32 %v1193_v12, %v1533_v36  ;;  %v366_v16 = vpop.f32.mrb[45].mxu0  ;;  %v629_v18 = vpop.f32.mrb[45].mxu1 }
 0x144   :  { %1001 = vst [vmem:[#allocation6 + $0x200] sm:$0xff] %v905_v8  ;;  %1017 = vst [vmem:[#allocation6 + $0x280] sm:$0xff] %v921_v9  ;;  %v812_v20 = vmul.f32 %v1533_v36, %v366_v16  ;;  %v831_v21 = vmul.f32 %v1533_v36, %v629_v18 }
 0x145   :  { %v907_v22 = vadd.f32 %v811_v14, %v714_v11  ;;  %v930_v23 = vadd.f32 %v834_v15, %v737_v13 }
 0x146   :  { %v908_v24 = vadd.f32 %v812_v20, %v715_v17  ;;  %v927_v25 = vadd.f32 %v831_v21, %v734_v19  ;;  %v370_v26 = vpop.f32.mrb[46].mxu0  ;;  %v1196_v28 = vpop.f32.mrb[46].mxu1 }
 0x147   :  { %1003 = vst [vmem:[#allocation6 + $0x210] sm:$0xff] %v907_v22  ;;  %1026 = vst [vmem:[#allocation6 + $0x2c8] sm:$0xff] %v930_v23  ;;  %v814_v30 = vmul.f32 %v1533_v36, %v370_v26  ;;  %v840_v31 = vmul.f32 %v1196_v28, %v1533_v36  ;;  %v372_v32 = vpop.f32.mrb[47].mxu0  ;;  %v639_v34 = vpop.f32.mrb[47].mxu1 }
 0x148   :  { %1004 = vst [vmem:[#allocation6 + $0x218] sm:$0xff] %v908_v24  ;;  %1023 = vst [vmem:[#allocation6 + $0x2b0] sm:$0xff] %v927_v25  ;;  %v815_v37 = vmul.f32 %v1533_v36, %v372_v32  ;;  %v837_v38 = vmul.f32 %v1533_v36, %v639_v34 }
 0x149   :  { %v910_v39 = vadd.f32 %v814_v30, %v717_v27  ;;  %v936_v40 = vadd.f32 %v840_v31, %v743_v29 }
 0x14a   :  { %v911_v41 = vadd.f32 %v815_v37, %v718_v33  ;;  %v933_v42 = vadd.f32 %v837_v38, %v740_v35 }
 0x14b   :  { %1006 = vst [vmem:[#allocation6 + $0x228] sm:$0xff] %v910_v39  ;;  %1032 = vst [vmem:[#allocation6 + $0x2f8] sm:$0xff] %v936_v40 }
 0x14c   :  { %1007 = vst [vmem:[#allocation6 + $0x230] sm:$0xff] %v911_v41  ;;  %1029 = vst [vmem:[#allocation6 + $0x2e0] sm:$0xff] %v933_v42 }
 0x14d   :  { %1237 = shalt.err (!%p1234_p12)
}
 0x14e   :  { %s1238_s24 = scalar_lea.hbm %s1650_s4, 12288 }
 0x14f   :  { %p1239_p13 = scmp.ne.s32.totalorder %s1650_s4, %s1238_s24  ;;  %p1242_p0 = scmp.lt.u32.totalorder %s1238_s24, %s1650_s4 }
 0x151   :  { %p1244_p1 = pnand %p1242_p0, %p1239_p13 }
 0x153   :  { %1247 = shalt.err (!%p1244_p1)
}
 0x154   :  { %1044 = dma.vmem_to_hbm [thread:$0]  %s1039_s20, 12288, %s1650_s4, [#allocation5], %s1253_s25, %s1253_s25, %s1254_s26  }
 0x155   :  { %1250 = dma.done.wait [#allocation5], 12288  }
 0x156   :  { %1251 = vsyncadd [#allocation5], 4294955008 }
 0x157   :  { %1048 = vsyncpa [#allocation4], 1 }
 0x158   :  { %1049 = vsyncpa [#allocation5], 1 }

</bundles_post_ra>
